<compile_context>
chip_gen: v7x
topology: tpu7x:2x2x1
jax: 0.10.0
libtpu: 0.0.40
codegen_flags: <defaults>
</compile_context>

<pallas_src>
import jax
import jax.numpy as jnp
from jax.experimental import pallas as pl
from jax.experimental.pallas import tpu as pltpu


def _round_up(x, m):
    return (x + m - 1) // m * m


def _default_vmem_limit():
    # ~3/4 of physical VMEM: ~96 MiB on v5e/v6e (128 MiB), ~48 MiB on v7x (64 MiB).
    try:
        cap = getattr(pltpu.get_tpu_info(), "vmem_capacity_bytes", None)
        if cap:
            return int(cap) * 3 // 4
    except Exception:
        pass
    return 48 * 1024 * 1024


_VMEM_LIMIT = _default_vmem_limit()


def _fit_batch_tile(requested, batch, row_bytes, budget):
    """Largest multiple-of-8 batch tile <= requested whose blocks fit `budget`."""
    bt = max(8, min(_round_up(requested, 8), _round_up(batch, 8)))
    while bt > 8 and bt * row_bytes > budget:
        bt = max(8, _round_up(bt // 2, 8))
    return bt


def _pick_col_tile(k_dim, out_dim, dtype_bytes, budget=24 * 1024 * 1024):
    """Column tile for the projection weight block (multiple of 128 or full)."""
    if out_dim % 128 != 0:
        return out_dim
    ct = out_dim
    while (ct > 128 and k_dim * ct * dtype_bytes * 2 > budget
           and ct % 2 == 0 and (ct // 2) % 128 == 0):
        ct //= 2
    return ct


# ---------------------------------------------------------------------------
# Kernel 1: row/col-tiled linear projection  y = x @ W + b  (bf16 MXU, f32 acc)
# ---------------------------------------------------------------------------
def _linear_kernel(x_ref, w_ref, b_ref, o_ref):
    y = jnp.dot(x_ref[...], w_ref[...], preferred_element_type=jnp.float32)
    o_ref[...] = (y + b_ref[...]).astype(o_ref.dtype)


def _linear_rows(x2d, w_t, b_row, *, tile_rows=512, out_dtype=jnp.float32):
    """x2d: (N, D), w_t: (D, O) pre-transposed, b_row: (1, O) f32 -> (N, O)."""
    n, d = x2d.shape
    out_dim = w_t.shape[1]
    tile = min(_round_up(max(tile_rows, 8), 8), _round_up(n, 8))
    n_pad = _round_up(n, tile)
    if n_pad != n:
        x2d = jnp.pad(x2d, ((0, n_pad - n), (0, 0)))
    col_tile = _pick_col_tile(d, out_dim, jnp.dtype(w_t.dtype).itemsize)
    out = pl.pallas_call(
        _linear_kernel,
        out_shape=jax.ShapeDtypeStruct((n_pad, out_dim), out_dtype),
        grid_spec=pltpu.PrefetchScalarGridSpec(
            num_scalar_prefetch=0,
            grid=(n_pad // tile, out_dim // col_tile),
            in_specs=[
                pl.BlockSpec((tile, d), lambda i, j: (i, 0)),        # x rows
                pl.BlockSpec((d, col_tile), lambda i, j: (0, j)),    # weights
                pl.BlockSpec((1, col_tile), lambda i, j: (0, j)),    # bias
            ],
            out_specs=pl.BlockSpec((tile, col_tile), lambda i, j: (i, j)),
        ),
        compiler_params=pltpu.CompilerParams(
            dimension_semantics=("parallel", "parallel"),
            vmem_limit_bytes=_VMEM_LIMIT),
    )(x2d, w_t, b_row)
    return out[:n]


# ---------------------------------------------------------------------------
# Kernel 2: fused bidirectional GRU recurrence (direction = parallel grid axis)
# ---------------------------------------------------------------------------
def _make_bigru_kernel(hidden, seq_len, unroll=2):
    def kernel(xp_ref, whh_ref, bhh_ref, len_ref, out_ref, h_ref):
        # xp_ref:  (T, bt, 3H)  compute-dtype input projection (direction slice)
        # whh_ref: (H, 3H)      compute-dtype recurrent weights (this direction)
        # bhh_ref: (1, 3H)      f32
        # len_ref: (bt, 1)      int32 sequence lengths
        # out_ref: (T, bt, H)   f32
        # h_ref:   VMEM scratch (bt, H) f32
        d = pl.program_id(0)                  # 0 = forward, 1 = backward
        h_ref[...] = jnp.zeros_like(h_ref)
        whh = whh_ref[...]                    # hoisted out of the time loop
        bhh = bhh_ref[...]
        lens = len_ref[...]                   # (bt, 1) int32

        def step(s, carry):
            t = jnp.where(d == 0, s, seq_len - 1 - s)
            x_t = xp_ref[t]                                      # (bt, 3H)
            m_t = (t < lens).astype(jnp.float32)                 # (bt, 1)
            h = h_ref[...]
            g_h = jnp.dot(h.astype(whh.dtype), whh,
                          preferred_element_type=jnp.float32) + bhh
            xr = x_t[:, 0:hidden]
            xz = x_t[:, hidden:2 * hidden]
            xn = x_t[:, 2 * hidden:3 * hidden]
            hr = g_h[:, 0:hidden]
            hz = g_h[:, hidden:2 * hidden]
            hn = g_h[:, 2 * hidden:3 * hidden]
            r = jax.nn.sigmoid(xr + hr)
            z = jax.nn.sigmoid(xz + hz)
            n = jnp.tanh(xn + r * hn)
            h_new = (1.0 - z) * n + z * h
            # packed-sequence emulation: only update / emit where t < length
            h_ref[...] = m_t * h_new + (1.0 - m_t) * h
            out_ref[t] = (m_t * h_new).astype(out_ref.dtype)
            return carry

        jax.lax.fori_loop(0, seq_len, step, 0, unroll=unroll)

    return kernel


def _bigru_recurrence(proj, whh, bhh, lengths_col, *, batch_tile, unroll=2):
    """proj: (T, B_pad, 6H) compute-dtype, whh: (2, H, 3H), bhh: (2, 1, 3H) f32,
    lengths_col: (B_pad, 1) int32.  Returns (2, T, B_pad, H) f32."""
    seq_len, b_pad, _ = proj.shape
    hidden = whh.shape[1]
    g3 = 3 * hidden
    bt = batch_tile

    if g3 % 128 == 0:
        # Select the direction half straight out of the shared projection.
        xp = proj
        xp_spec = pl.BlockSpec((seq_len, bt, g3), lambda d, i: (0, i, d))
    else:
        # Fallback for hidden % 128 != 0: per-direction halves are materialized.
        xp = jnp.stack([proj[..., :g3], proj[..., g3:]], axis=0)   # (2, T, B, 3H)
        xp_spec = pl.BlockSpec((None, seq_len, bt, g3), lambda d, i: (d, 0, i, 0))

    out = pl.pallas_call(
        _make_bigru_kernel(hidden, seq_len, unroll),
        out_shape=jax.ShapeDtypeStruct((2, seq_len, b_pad, hidden), jnp.float32),
        grid_spec=pltpu.PrefetchScalarGridSpec(
            num_scalar_prefetch=0,
            grid=(2, b_pad // bt),
            in_specs=[
                xp_spec,
                pl.BlockSpec((None, hidden, g3), lambda d, i: (d, 0, 0)),
                pl.BlockSpec((None, 1, g3), lambda d, i: (d, 0, 0)),
                pl.BlockSpec((bt, 1), lambda d, i: (i, 0)),
            ],
            out_specs=pl.BlockSpec((None, seq_len, bt, hidden),
                                   lambda d, i: (d, 0, i, 0)),
            scratch_shapes=[pltpu.VMEM((bt, hidden), jnp.float32)],
        ),
        compiler_params=pltpu.CompilerParams(
            dimension_semantics=("parallel", "parallel"),
            vmem_limit_bytes=_VMEM_LIMIT),
    )(xp, whh, bhh, lengths_col)
    return out


# ---------------------------------------------------------------------------
# Kernel 3: direction-average + l2norm + temporal mean + l2norm
# ---------------------------------------------------------------------------
def _make_pool_kernel(seq_len, no_txtnorm, use_abs, approx):
    inv_t = 1.0 / float(seq_len)

    def kernel(dir_ref, cap_ref, mean_ref):
        fwd = dir_ref[0]                                           # (T, bt, H)
        bwd = dir_ref[1]
        cap = (fwd + bwd) * 0.5
        if not no_txtnorm:
            nrm = jnp.sqrt(jnp.sum(cap * cap, axis=-1, keepdims=True)) + 1e-8
            cap = cap * pl.reciprocal(nrm, approx=approx)
        if use_abs:
            cap = jnp.abs(cap)
        cap_ref[...] = cap.astype(cap_ref.dtype)
        mean = jnp.sum(cap, axis=0) * inv_t                        # (bt, H)
        if not no_txtnorm:
            nrm2 = jnp.sqrt(jnp.sum(mean * mean, axis=-1, keepdims=True)) + 1e-8
            mean = mean * pl.reciprocal(nrm2, approx=approx)
        mean_ref[...] = mean.astype(mean_ref.dtype)

    return kernel


def _bi_merge_pool(out_dirs, *, no_txtnorm, use_abs, batch_tile, approx):
    _, seq_len, b_pad, hidden = out_dirs.shape
    bt = batch_tile
    cap, mean = pl.pallas_call(
        _make_pool_kernel(seq_len, no_txtnorm, use_abs, approx),
        out_shape=(jax.ShapeDtypeStruct((seq_len, b_pad, hidden), jnp.float32),
                   jax.ShapeDtypeStruct((b_pad, hidden), jnp.float32)),
        grid_spec=pltpu.PrefetchScalarGridSpec(
            num_scalar_prefetch=0,
            grid=(b_pad // bt,),
            in_specs=[pl.BlockSpec((2, seq_len, bt, hidden),
                                   lambda i: (0, 0, i, 0))],
            out_specs=[pl.BlockSpec((seq_len, bt, hidden), lambda i: (0, i, 0)),
                       pl.BlockSpec((bt, hidden), lambda i: (i, 0))],
        ),
        compiler_params=pltpu.CompilerParams(
            dimension_semantics=("parallel",),
            vmem_limit_bytes=_VMEM_LIMIT),
    )(out_dirs)
    return cap, mean


# ---------------------------------------------------------------------------
# Full EncoderText forward
# ---------------------------------------------------------------------------
def encoder_text_forward(token_ids, lengths, embed_weight, gru_params, *,
                         no_txtnorm=False, use_abs=False,
                         compute_dtype=jnp.bfloat16,
                         proj_tile_rows=512, batch_tile=128,
                         approx_recip=True):
    """token_ids: (B, T) int32, lengths: (B,) int32 (x padded to max(lengths)).

    gru_params: list over layers of dicts with keys
      w_ih_fw/w_ih_bw: (3H, in_dim), w_hh_fw/w_hh_bw: (3H, H),
      b_ih_fw/b_ih_bw/b_hh_fw/b_hh_bw: (3H,).
    Returns (cap_emb (B, T, H) f32, cap_emb_mean (B, H) f32).
    """
    batch, seq_len = token_ids.shape
    hidden = gru_params[0]["w_hh_fw"].shape[1]
    cd = compute_dtype
    cdb = jnp.dtype(cd).itemsize

    # VMEM-budgeted batch tile (blocks: xp + out for the recurrence, both
    # directions + cap for the pool; all double buffered).
    rec_row_bytes = 2 * seq_len * (3 * hidden * cdb + hidden * 4)
    pool_row_bytes = 2 * (2 * seq_len * hidden * 4) + 2 * (seq_len * hidden * 4)
    bt = _fit_batch_tile(batch_tile, batch,
                         max(rec_row_bytes, pool_row_bytes), _VMEM_LIMIT // 2)
    b_pad = _round_up(batch, bt)
    if b_pad != batch:
        token_ids = jnp.pad(token_ids, ((0, b_pad - batch), (0, 0)))
        lengths = jnp.pad(lengths, (0, b_pad - batch))
    lengths_col = lengths.astype(jnp.int32)[:, None]                 # (B_pad, 1)

    # Embedding lookup, gathered time-major directly (no (B,T,D) transpose),
    # emitted in compute dtype.
    # TODO(synk): data-dependent row gather is left to XLA (jnp.take).
    x = jnp.take(embed_weight, token_ids.T, axis=0).astype(cd)       # (T, B_pad, D)
    # Dropout: identity at inference.

    layer_in = x
    out_dirs = None
    for li, lp in enumerate(gru_params):
        in_dim = layer_in.shape[-1]
        # Fused input projection for both directions: one lane-dense bf16 matmul.
        w_cat = jnp.concatenate([lp["w_ih_fw"].T, lp["w_ih_bw"].T],
                                axis=1).astype(cd)                    # (in_dim, 6H)
        b_cat = jnp.concatenate([lp["b_ih_fw"], lp["b_ih_bw"]]
                                )[None, :].astype(jnp.float32)        # (1, 6H)
        proj = _linear_rows(layer_in.reshape(seq_len * b_pad, in_dim),
                            w_cat, b_cat, tile_rows=proj_tile_rows, out_dtype=cd)
        proj = proj.reshape(seq_len, b_pad, 6 * hidden)

        whh = jnp.stack([lp["w_hh_fw"].T, lp["w_hh_bw"].T], axis=0).astype(cd)
        bhh = jnp.stack([lp["b_hh_fw"][None, :], lp["b_hh_bw"][None, :]],
                        axis=0).astype(jnp.float32)

        out_dirs = _bigru_recurrence(proj, whh, bhh, lengths_col,
                                     batch_tile=bt)                   # (2,T,B,H) f32
        if li + 1 < len(gru_params):
            # TODO(synk): stacked-layer handoff uses an XLA slice+concat HBM pass.
            layer_in = jnp.concatenate([out_dirs[0], out_dirs[1]],
                                       axis=-1).astype(cd)

    cap_tbh, mean_bh = _bi_merge_pool(out_dirs, no_txtnorm=no_txtnorm,
                                      use_abs=use_abs, batch_tile=bt,
                                      approx=approx_recip)
    # TODO(synk): final time-major -> batch-major transpose still done by XLA.
    cap_emb = jnp.transpose(cap_tbh[:, :batch, :], (1, 0, 2))          # (B, T, H)
    return cap_emb, mean_bh[:batch]


# ---------------------------------------------------------------------------
# Pure-JAX reference mirroring the kernel's bf16-operand / f32-accumulation
# numerics (the bf16 casts are the documented perf tradeoff vs exact f32).
# ---------------------------------------------------------------------------
def _reference(token_ids, lengths, embed_weight, gru_params, *,
               no_txtnorm=False, use_abs=False, compute_dtype=jnp.bfloat16):
    cd = compute_dtype
    batch, seq_len = token_ids.shape
    hidden = gru_params[0]["w_hh_fw"].shape[1]
    x = embed_weight[token_ids].astype(cd)                             # (B, T, D)
    mask = (jnp.arange(seq_len)[None, :] < lengths[:, None]).astype(jnp.float32)

    def proj(inp, w_ih, b_ih):
        g = jnp.dot(inp.reshape(-1, inp.shape[-1]), w_ih.T.astype(cd),
                    preferred_element_type=jnp.float32) + b_ih.astype(jnp.float32)
        return g.astype(cd).reshape(batch, seq_len, 3 * hidden)

    def run_dir(gx, w_hh, b_hh, reverse):
        whh = w_hh.T.astype(cd)
        bhh = b_hh.astype(jnp.float32)
        h = jnp.zeros((batch, hidden), jnp.float32)
        outs = [None] * seq_len
        order = range(seq_len - 1, -1, -1) if reverse else range(seq_len)
        for t in order:
            g_h = jnp.dot(h.astype(cd), whh,
                          preferred_element_type=jnp.float32) + bhh
            x_t = gx[:, t, :]
            xr, xz, xn = (x_t[:, :hidden], x_t[:, hidden:2 * hidden],
                          x_t[:, 2 * hidden:])
            hr, hz, hn = (g_h[:, :hidden], g_h[:, hidden:2 * hidden],
                          g_h[:, 2 * hidden:])
            r = jax.nn.sigmoid(xr + hr)
            z = jax.nn.sigmoid(xz + hz)
            n = jnp.tanh(xn + r * hn)
            h_new = (1.0 - z) * n + z * h
            m = mask[:, t:t + 1]
            h = m * h_new + (1.0 - m) * h
            outs[t] = m * h_new
        return jnp.stack(outs, axis=1)                                 # (B, T, H)

    layer_in = x
    fwd = bwd = None
    for lp in gru_params:
        gx_fw = proj(layer_in, lp["w_ih_fw"], lp["b_ih_fw"])
        gx_bw = proj(layer_in, lp["w_ih_bw"], lp["b_ih_bw"])
        fwd = run_dir(gx_fw, lp["w_hh_fw"], lp["b_hh_fw"], False)
        bwd = run_dir(gx_bw, lp["w_hh_bw"], lp["b_hh_bw"], True)
        layer_in = jnp.concatenate([fwd, bwd], axis=-1).astype(cd)

    cap = (fwd + bwd) * 0.5
    if not no_txtnorm:
        cap = cap / (jnp.sqrt(jnp.sum(cap * cap, axis=-1, keepdims=True)) + 1e-8)
    if use_abs:
        cap = jnp.abs(cap)
    mean = jnp.mean(cap, axis=1)
    if not no_txtnorm:
        mean = mean / (jnp.sqrt(jnp.sum(mean * mean, axis=-1, keepdims=True)) + 1e-8)
    return cap, mean


if __name__ == "__main__":
    # H=128 keeps the gate slices lane-aligned and exercises the in-place
    # direction-half BlockSpec selection (3H % 128 == 0).
    vocab_size, word_dim, embed_size = 64, 32, 128
    batch, seq_len, num_layers = 4, 16, 1

    key = jax.random.PRNGKey(0)
    keys = jax.random.split(key, 16)

    token_ids = jax.random.randint(keys[0], (batch, seq_len), 0, vocab_size)
    # lengths sorted descending, max == seq_len (standard VSE collate padding).
    lengths = jnp.array([seq_len, 12, 9, 5], dtype=jnp.int32)
    embed_w = jax.random.normal(keys[1], (vocab_size, word_dim), jnp.float32) * 0.1

    params = []
    kidx = 2
    in_dim = word_dim
    for _ in range(num_layers):
        lp = {}
        for d in ("fw", "bw"):
            lp[f"w_ih_{d}"] = jax.random.normal(keys[kidx], (3 * embed_size, in_dim)) * 0.1; kidx += 1
            lp[f"w_hh_{d}"] = jax.random.normal(keys[kidx], (3 * embed_size, embed_size)) * 0.1; kidx += 1
            lp[f"b_ih_{d}"] = jax.random.normal(keys[kidx], (3 * embed_size,)) * 0.1; kidx += 1
            lp[f"b_hh_{d}"] = jax.random.normal(keys[kidx], (3 * embed_size,)) * 0.1; kidx += 1
        params.append(lp)
        in_dim = 2 * embed_size

    cap_emb, cap_mean = encoder_text_forward(token_ids, lengths, embed_w, params)
    cap_emb = jax.block_until_ready(cap_emb)
    cap_mean = jax.block_until_ready(cap_mean)

    ref_cap, ref_mean = _reference(token_ids, lengths, embed_w, params)

    assert cap_emb.shape == (batch, seq_len, embed_size)
    assert cap_mean.shape == (batch, embed_size)
    # Tolerance covers the EUP approx-reciprocal in the pool and MXU-vs-XLA
    # f32 accumulation-order differences (both paths use bf16 matmul operands);
    # any semantic bug would be orders of magnitude larger.
    assert jnp.allclose(cap_emb, ref_cap, atol=5e-3, rtol=5e-3)
    assert jnp.allclose(cap_mean, ref_mean, atol=5e-3, rtol=5e-3)
    print("KERNEL_OK")
</pallas_src>

<mosaic_0001>
module attributes {stable_mosaic.version = 11 : i64} {
  func.func @_linear_kernel(%arg0: i32, %arg1: i32, %arg2: memref<128x32xbf16, #tpu.memory_space<vmem>>, %arg3: memref<32x768xbf16, #tpu.memory_space<vmem>>, %arg4: memref<1x768xf32, #tpu.memory_space<vmem>>, %arg5: memref<128x768xbf16, #tpu.memory_space<vmem>>) attributes {dimension_semantics = [#tpu.dimension_semantics<parallel>, #tpu.dimension_semantics<parallel>], iteration_bounds = array<i64: 1, 1>, scalar_prefetch = 0 : i64, scratch_operands = 0 : i64, tpu.core_type = #tpu.core_type<tc>, window_params = [{transform_indices = @transform_0, window_bounds = array<i64: 128, 32>}, {transform_indices = @transform_1, window_bounds = array<i64: 32, 768>}, {transform_indices = @transform_2, window_bounds = array<i64: 1, 768>}, {transform_indices = @transform_3, window_bounds = array<i64: 128, 768>}]} {
    %c0 = arith.constant 0 : index
    %c0_0 = arith.constant 0 : index
    %0 = vector.load %arg2[%c0, %c0_0] : memref<128x32xbf16, #tpu.memory_space<vmem>>, vector<128x32xbf16>
    %c0_1 = arith.constant 0 : index
    %c0_2 = arith.constant 0 : index
    %1 = vector.load %arg3[%c0_1, %c0_2] : memref<32x768xbf16, #tpu.memory_space<vmem>>, vector<32x768xbf16>
    %cst = arith.constant dense<0.000000e+00> : vector<128x768xf32>
    %2 = tpu.matmul %0, %1, %cst {dimension_numbers = #tpu.dot_dimension_numbers<[1], [0], [0], [1], [0, 0, 1, 1], [], []>} : vector<128x32xbf16>, vector<32x768xbf16>, vector<128x768xf32> -> vector<128x768xf32>
    %c0_3 = arith.constant 0 : index
    %c0_4 = arith.constant 0 : index
    %3 = vector.load %arg4[%c0_3, %c0_4] : memref<1x768xf32, #tpu.memory_space<vmem>>, vector<1x768xf32>
    %4 = vector.broadcast %3 : vector<1x768xf32> to vector<128x768xf32>
    %5 = arith.addf %2, %4 : vector<128x768xf32>
    %6 = arith.truncf %5 : vector<128x768xf32> to vector<128x768xbf16>
    %c0_5 = arith.constant 0 : index
    %c0_6 = arith.constant 0 : index
    %7 = vector.load %arg5[%c0_5, %c0_6] : memref<128x768xbf16, #tpu.memory_space<vmem>>, vector<128x768xbf16>
    tpu.vector_store %arg5[%c0_5, %c0_6], %6 {strides = array<i32>} : memref<128x768xbf16, #tpu.memory_space<vmem>>, vector<128x768xbf16>,
    return
  }
  func.func @transform_0(%arg0: i32, %arg1: i32) -> (i32, i32) {
    %c0_i32 = arith.constant 0 : i32
    %c0_i32_0 = arith.constant 0 : i32
    return %arg0, %c0_i32 : i32, i32
  }
  func.func @transform_1(%arg0: i32, %arg1: i32) -> (i32, i32) {
    %c0_i32 = arith.constant 0 : i32
    %c0_i32_0 = arith.constant 0 : i32
    return %c0_i32, %arg1 : i32, i32
  }
  func.func @transform_2(%arg0: i32, %arg1: i32) -> (i32, i32) {
    %c0_i32 = arith.constant 0 : i32
    %c0_i32_0 = arith.constant 0 : i32
    return %c0_i32, %arg1 : i32, i32
  }
  func.func @transform_3(%arg0: i32, %arg1: i32) -> (i32, i32) {
    %c0_i32 = arith.constant 0 : i32
    return %arg0, %arg1 : i32, i32
  }
}

</mosaic_0001>

<bundles_post_ra>
// kernel: tpu_custom_call.1
= control target key start
LH: loop header
LB: loop body
LE: loop exit
PB: predicated region body
PF: predicated region fallthrough
CT: control target
= control target key end

     0   :  { %8 = vsyncpa [#allocation3], 0  ;;  %s1384_s0 = inlined_call_operand.vmem [shape: bf16[128,32], index: 0, kind: input, shape index: {}]   ;;  %s1385_s1 = inlined_call_operand.hbm [shape: bf16[32,768], index: 1, kind: input, shape index: {}]   ;;  %s1386_s2 = inlined_call_operand.vmem [shape: f32[1,768], index: 2, kind: input, shape index: {}]   ;;  %s1387_s3 = inlined_call_operand.hbm [shape: bf16[128,768], index: 3, kind: output, shape index: {}]  }
   0x1   :  { %9 = vsyncpa [#allocation4], 0  ;;  %s1130_s12 = smov [#allocation2]   ;;  %s1082_s16 = scalar_lea.hbm %s1385_s1, 1536 }
   0x2   :  { %s17_s13 = sshll.u32 %s1130_s12, 4  ;;  %p1083_p0 = scmp.ne.s32.totalorder %s1385_s1, %s1082_s16  ;;  %s18_s13 = int_to_ptr.vmem [resolvable:$true] %s17_s13 }
   0x3   :  { %p1086_p1 = scmp.lt.u32.totalorder %s1082_s16, %s1385_s1 }
   0x5   :  { %p1088_p2 = pnand %p1086_p1, %p1083_p0 }
   0x7   :  { %1091 = shalt.err (!%p1088_p2)
}
   0x8   :  { %s1092_s21 = scalar_lea.vmem %s18_s13, 1536  ;;  %p1097_p4 = scmp.lt.s32.totalorder %s18_s13, %s18_s13 }
   0x9   :  { %p1093_p3 = scmp.ne.s32.totalorder %s18_s13, %s1092_s21  ;;  %p1098_p5 = scmp.lt.s32.totalorder %s1092_s21, %s1092_s21 }
   0xb   :  { %p1099_p6 = por %p1098_p5, %p1097_p4 }
   0xd   :  { %p1100_p7 = pnand %p1099_p6, %p1093_p3 }
   0xf   :  { %1103 = shalt.err (!%p1100_p7)
}
  0x10   :  { %s1131_s22 = smov 384   ;;  %s1132_s23 = smov 24  }
  0x11   :  { %23 = dma.hbm_to_vmem [thread:$0]  %s1385_s1, 1536, %s18_s13, [#allocation3], %s1131_s22, %s1131_s22, %s1132_s23  }
  0x12   :  { %1126 = dma.done.wait [#allocation3], 1536  }
  0x13   :  { %1127 = vsyncadd [#allocation3], 4294965760  ;;  %v1133_v0 = vmov 0   ;;  %v1056_v1 = vld [vmem:[#allocation2 + $0x4] ss:$24 sps:$4 sm:$0xff]   ;;  %vm190_vm0 = vcmask 261120   ;;  %v60_v21 = vlaneseq }
  0x14   :  { %247 = vmatprep.mubr.bf16.mxu0 %v1133_v0  ;;  %287 = vmatprep.mubr.bf16.mxu1 %v1133_v0  ;;  %v1058_v2 = vld [vmem:[#allocation2] ss:$24 sps:$4 sm:$0xff]   ;;  %v1059_v3 = vld [vmem:[#allocation2 + $0x34] ss:$24 sps:$4 sm:$0xff]   ;;  %v1061_v4 = vld [vmem:[#allocation2 + $0x30] ss:$24 sps:$4 sm:$0xff]  }
  0x15   :  { %215 = vmatprep.subr.bf16.mxu0 %v1056_v1  ;;  %1047 = vmatprep.subr.bf16.mxu1 %v1056_v1  ;;  %v1062_v5 = vld [vmem:[%s1384_s0] sm:$0xff]   ;;  %v1067_v9 = vld [vmem:[#allocation2 + $0x10] ss:$24 sps:$4 sm:$0xff]   ;;  %v1069_v10 = vld [vmem:[#allocation2 + $0x14] ss:$24 sps:$4 sm:$0xff]   ;;  %v1242_v22 = vshrl.u32 %v60_v21, 7 }
  0x16   :  { %216 = vmatpush1.bf16.msra.mxu0 %v1058_v2  ;;  %1049 = vmatpush1.bf16.msra.mxu1 %v1058_v2  ;;  %v1063_v6 = vld [vmem:[%s1384_s0 + $0x20] sm:$0xff]   ;;  %v1070_v11 = vld [vmem:[%s1384_s0 + $0x8] sm:$0xff]   ;;  %v1074_v12 = vld [vmem:[#allocation2 + $0x38] ss:$24 sps:$4 sm:$0xff]  }
  0x17   :  { %217 = vmatprep.subr.bf16.mxu0 %v1059_v3  ;;  %1048 = vmatprep.subr.bf16.mxu1 %v1059_v3  ;;  %v1064_v7 = vld [vmem:[#allocation2 + $0x8] ss:$24 sps:$4 sm:$0xff]   ;;  %v1066_v8 = vld [vmem:[#allocation2 + $0xc] ss:$24 sps:$4 sm:$0xff]   ;;  %v1076_v13 = vld [vmem:[#allocation2 + $0x3c] ss:$24 sps:$4 sm:$0xff]  }
  0x18   :  { %v1077_v14 = vld [vmem:[#allocation2 + $0x40] ss:$24 sps:$4 sm:$0xff]   ;;  %v1079_v15 = vld [vmem:[#allocation2 + $0x44] ss:$24 sps:$4 sm:$0xff]   ;;  %v1071_v16 = vld [vmem:[%s1384_s0 + $0x28] sm:$0xff]   ;;  %v62_v23 = vsub.s32 0, %v1242_v22 }
  0x19   :  { %v1072_v17 = vld [vmem:[%s1384_s0 + $0x10] sm:$0xff]   ;;  %v1080_v19 = vld [vmem:[%s1384_s0 + $0x18] sm:$0xff]   ;;  %v1248_v24 = vld [vmem:[%s1386_s2] sm:$0x3f]  ;;  %v66_v25 = vsub.s32 1, %v1242_v22  ;;  %s1134_s2 = smov [#allocation5]  }
  0x1a   :  { %218 = vmatpush1.bf16.msra.mxu0 %v1061_v4  ;;  %1050 = vmatpush1.bf16.msra.mxu1 %v1061_v4  ;;  %v1073_v18 = vld [vmem:[%s1384_s0 + $0x30] sm:$0xff]   ;;  %v1081_v20 = vld [vmem:[%s1384_s0 + $0x38] sm:$0xff]   ;;  %v1252_v26 = vrot.slane %v1248_v24, %v62_v23  ;;  %s895_s15 = sshll.u32 %s1134_s2, 4  ;;  %s896_s15 = int_to_ptr.vmem [resolvable:$true] %s895_s15 }
  0x1b   :  { %328 = vmatprep.subr.bf16.mxu1 %v1066_v8  ;;  %441 = vmatprep.subr.bf16.mxu0 %v1069_v10  ;;  %v1255_v27 = vrot.slane %v1248_v24, %v66_v25  ;;  %s1104_s16 = scalar_lea.vmem %s896_s15, 6144  ;;  %p1109_p9 = scmp.lt.s32.totalorder %s896_s15, %s896_s15 }
  0x1c   :  { %p1105_p8 = scmp.ne.s32.totalorder %s896_s15, %s1104_s16  ;;  %p1110_p10 = scmp.lt.s32.totalorder %s1104_s16, %s1104_s16 }
  0x1d   :  { %927 = vmatmul.mubr.msk.bf16.vlgmr.msra.gmra.mrb[0].mxu0 %vm190_vm0, %v1062_v5  ;;  %931 = vmatmul.mubr.msk.bf16.vlgmr.msra.gmra.mrb[0].mxu1 %vm190_vm0, %v1063_v6 }
  0x1e   :  { %329 = vmatpush1.bf16.msra.mxu1 %v1064_v7  ;;  %442 = vmatpush1.bf16.msra.mxu0 %v1067_v9  ;;  %p1111_p11 = por %p1110_p10, %p1109_p9 }
  0x1f   :  { %257 = vmatprep.mubr.bf16.mxu0 %v1133_v0  ;;  %297 = vmatprep.mubr.bf16.mxu1 %v1133_v0 }
  0x20   :  { %330 = vmatprep.subr.bf16.mxu1 %v1076_v13  ;;  %443 = vmatprep.subr.bf16.mxu0 %v1079_v15  ;;  %p1112_p12 = pnand %p1111_p11, %p1105_p8 }
  0x22   :  { %331 = vmatpush1.bf16.msra.mxu1 %v1074_v12  ;;  %444 = vmatpush1.bf16.msra.mxu0 %v1077_v14 }
  0x25   :  { %928 = vmatmul.mubr.msk.bf16.gmra.mrb[4].mxu0 %vm190_vm0, %v1070_v11  ;;  %932 = vmatmul.mubr.msk.bf16.gmra.mrb[4].mxu1 %vm190_vm0, %v1071_v16 }
  0x26   :  { %267 = vmatprep.mubr.bf16.mxu0 %v1133_v0  ;;  %307 = vmatprep.mubr.bf16.mxu1 %v1133_v0 }
  0x2d   :  { %929 = vmatmul.mubr.msk.bf16.gmra.mrb[8].mxu0 %vm190_vm0, %v1072_v17  ;;  %933 = vmatmul.mubr.msk.bf16.gmra.mrb[8].mxu1 %vm190_vm0, %v1073_v18 }
  0x2e   :  { %277 = vmatprep.mubr.bf16.mxu0 %v1133_v0  ;;  %317 = vmatprep.mubr.bf16.mxu1 %v1133_v0 }
  0x35   :  { %930 = vmatmul.mubr.msk.bf16.gmra.mrb[12].mxu0 %vm190_vm0, %v1080_v19  ;;  %934 = vmatmul.mubr.msk.bf16.gmra.mrb[12].mxu1 %vm190_vm0, %v1081_v20 }
  0x36   :  { %360 = vmatprep.mubr.bf16.mxu1 %v1133_v0  ;;  %473 = vmatprep.mubr.bf16.mxu0 %v1133_v0 }
  0x3d   :  { %935 = vmatmul.mubr.msk.bf16.vlgmr.msra.gmra.mrb[16].mxu1 %vm190_vm0, %v1062_v5  ;;  %943 = vmatmul.mubr.msk.bf16.vlgmr.msra.gmra.mrb[16].mxu0 %vm190_vm0, %v1062_v5 }
  0x3e   :  { %370 = vmatprep.mubr.bf16.mxu1 %v1133_v0  ;;  %483 = vmatprep.mubr.bf16.mxu0 %v1133_v0 }
  0x45   :  { %936 = vmatmul.mubr.msk.bf16.gmra.mrb[20].mxu1 %vm190_vm0, %v1070_v11  ;;  %944 = vmatmul.mubr.msk.bf16.gmra.mrb[20].mxu0 %vm190_vm0, %v1070_v11 }
  0x46   :  { %380 = vmatprep.mubr.bf16.mxu1 %v1133_v0  ;;  %493 = vmatprep.mubr.bf16.mxu0 %v1133_v0 }
  0x4d   :  { %937 = vmatmul.mubr.msk.bf16.gmra.mrb[24].mxu1 %vm190_vm0, %v1072_v17  ;;  %945 = vmatmul.mubr.msk.bf16.gmra.mrb[24].mxu0 %vm190_vm0, %v1072_v17 }
  0x4e   :  { %390 = vmatprep.mubr.bf16.mxu1 %v1133_v0  ;;  %503 = vmatprep.mubr.bf16.mxu0 %v1133_v0 }
  0x55   :  { %938 = vmatmul.mubr.msk.bf16.gmra.mrb[28].mxu1 %vm190_vm0, %v1080_v19  ;;  %946 = vmatmul.mubr.msk.bf16.gmra.mrb[28].mxu0 %vm190_vm0, %v1080_v19 }
  0x56   :  { %400 = vmatprep.mubr.bf16.mxu1 %v1133_v0  ;;  %513 = vmatprep.mubr.bf16.mxu0 %v1133_v0 }
  0x5d   :  { %939 = vmatmul.mubr.msk.bf16.gmra.mrb[32].mxu1 %vm190_vm0, %v1063_v6  ;;  %947 = vmatmul.mubr.msk.bf16.gmra.mrb[32].mxu0 %vm190_vm0, %v1063_v6 }
  0x5e   :  { %410 = vmatprep.mubr.bf16.mxu1 %v1133_v0  ;;  %523 = vmatprep.mubr.bf16.mxu0 %v1133_v0 }
  0x65   :  { %940 = vmatmul.mubr.msk.bf16.gmra.mrb[36].mxu1 %vm190_vm0, %v1071_v16  ;;  %948 = vmatmul.mubr.msk.bf16.gmra.mrb[36].mxu0 %vm190_vm0, %v1071_v16 }
  0x66   :  { %420 = vmatprep.mubr.bf16.mxu1 %v1133_v0  ;;  %533 = vmatprep.mubr.bf16.mxu0 %v1133_v0 }
  0x6d   :  { %941 = vmatmul.mubr.msk.bf16.gmra.mrb[40].mxu1 %vm190_vm0, %v1073_v18  ;;  %949 = vmatmul.mubr.msk.bf16.gmra.mrb[40].mxu0 %vm190_vm0, %v1073_v18 }
  0x6e   :  { %430 = vmatprep.mubr.bf16.mxu1 %v1133_v0  ;;  %543 = vmatprep.mubr.bf16.mxu0 %v1133_v0 }
  0x75   :  { %942 = vmatmul.mubr.msk.bf16.gmra.mrb[44].mxu1 %vm190_vm0, %v1081_v20  ;;  %950 = vmatmul.mubr.msk.bf16.gmra.mrb[44].mxu0 %vm190_vm0, %v1081_v20 }
  0xf0   :  { %v249_v28 = vpop.f32.mrb[0].mxu0  ;;  %v289_v29 = vpop.f32.mrb[0].mxu1 }
  0xf1   :  { %v250_v30 = vadd.f32 %v249_v28, %v1252_v26  ;;  %v290_v31 = vadd.f32 %v289_v29, %v1252_v26  ;;  %v251_v32 = vpop.f32.mrb[1].mxu0  ;;  %v291_v33 = vpop.f32.mrb[1].mxu1 }
  0xf2   :  { %v252_v34 = vadd.f32 %v251_v32, %v1255_v27  ;;  %v292_v35 = vadd.f32 %v291_v33, %v1255_v27  ;;  %v253_v36 = vpop.f32.mrb[2].mxu0  ;;  %v293_v37 = vpop.f32.mrb[2].mxu1 }
  0xf3   :  { %v254_v38 = vadd.f32 %v253_v36, %v1252_v26  ;;  %v294_v39 = vadd.f32 %v293_v37, %v1252_v26  ;;  %v255_v40 = vpop.f32.mrb[3].mxu0  ;;  %v295_v41 = vpop.f32.mrb[3].mxu1 }
  0xf4   :  { %v999_v42 = vpack.c.bf16 %v252_v34, %v250_v30  ;;  %v1023_v43 = vpack.c.bf16 %v292_v35, %v290_v31  ;;  %v256_v44 = vadd.f32 %v255_v40, %v1255_v27  ;;  %v296_v45 = vadd.f32 %v295_v41, %v1255_v27 }
  0xf5   :  { %v70_v34 = vsub.s32 2, %v1242_v22  ;;  %v78_v35 = vsub.s32 4, %v1242_v22  ;;  %v74_v40 = vsub.s32 3, %v1242_v22  ;;  %v82_v41 = vsub.s32 5, %v1242_v22 }
  0xf6   :  { %842 = vst [vmem:[#allocation5] sm:$0xff] %v999_v42  ;;  %866 = vst [vmem:[#allocation5 + $0xc0] sm:$0xff] %v1023_v43  ;;  %v1002_v46 = vpack.c.bf16 %v256_v44, %v254_v38  ;;  %v1026_v47 = vpack.c.bf16 %v296_v45, %v294_v39 }
  0xf8   :  { %845 = vst [vmem:[#allocation5 + $0x18] sm:$0xff] %v1002_v46  ;;  %869 = vst [vmem:[#allocation5 + $0xd8] sm:$0xff] %v1026_v47  ;;  %v259_v48 = vpop.f32.mrb[4].mxu0  ;;  %v299_v49 = vpop.f32.mrb[4].mxu1 }
  0xf9   :  { %v260_v50 = vadd.f32 %v259_v48, %v1252_v26  ;;  %v300_v51 = vadd.f32 %v299_v49, %v1252_v26  ;;  %v261_v52 = vpop.f32.mrb[5].mxu0  ;;  %v301_v53 = vpop.f32.mrb[5].mxu1 }
  0xfa   :  { %v262_v54 = vadd.f32 %v261_v52, %v1255_v27  ;;  %v302_v55 = vadd.f32 %v301_v53, %v1255_v27  ;;  %v263_v56 = vpop.f32.mrb[6].mxu0  ;;  %v303_v57 = vpop.f32.mrb[6].mxu1  ;;  %v1303_v53 = vrot.slane %v1248_v24, %v82_v41 }
  0xfb   :  { %v264_v58 = vadd.f32 %v263_v56, %v1252_v26  ;;  %v304_v59 = vadd.f32 %v303_v57, %v1252_v26  ;;  %v265_v60 = vpop.f32.mrb[7].mxu0  ;;  %v305_v61 = vpop.f32.mrb[7].mxu1 }
  0xfc   :  { %v1005_v62 = vpack.c.bf16 %v262_v54, %v260_v50  ;;  %v1029_v63 = vpack.c.bf16 %v302_v55, %v300_v51  ;;  %v266_v0 = vadd.f32 %v265_v60, %v1255_v27  ;;  %v306_v1 = vadd.f32 %v305_v61, %v1255_v27 }
  0xfd   :  { %v1294_v50 = vrot.slane %v1248_v24, %v70_v34  ;;  %v1297_v51 = vrot.slane %v1248_v24, %v78_v35 }
  0xfe   :  { %848 = vst [vmem:[#allocation5 + $0x30] sm:$0xff] %v1005_v62  ;;  %872 = vst [vmem:[#allocation5 + $0xf0] sm:$0xff] %v1029_v63  ;;  %v1008_v2 = vpack.c.bf16 %v266_v0, %v264_v58  ;;  %v1032_v3 = vpack.c.bf16 %v306_v1, %v304_v59 }
 0x100   :  { %851 = vst [vmem:[#allocation5 + $0x48] sm:$0xff] %v1008_v2  ;;  %875 = vst [vmem:[#allocation5 + $0x108] sm:$0xff] %v1032_v3  ;;  %v269_v4 = vpop.f32.mrb[8].mxu0  ;;  %v309_v5 = vpop.f32.mrb[8].mxu1 }
 0x101   :  { %v270_v6 = vadd.f32 %v269_v4, %v1252_v26  ;;  %v310_v7 = vadd.f32 %v309_v5, %v1252_v26  ;;  %v271_v8 = vpop.f32.mrb[9].mxu0  ;;  %v311_v9 = vpop.f32.mrb[9].mxu1 }
 0x102   :  { %v272_v10 = vadd.f32 %v271_v8, %v1255_v27  ;;  %v312_v11 = vadd.f32 %v311_v9, %v1255_v27  ;;  %v273_v12 = vpop.f32.mrb[10].mxu0  ;;  %v313_v13 = vpop.f32.mrb[10].mxu1 }
 0x103   :  { %v274_v14 = vadd.f32 %v273_v12, %v1252_v26  ;;  %v314_v15 = vadd.f32 %v313_v13, %v1252_v26  ;;  %v275_v16 = vpop.f32.mrb[11].mxu0  ;;  %v315_v17 = vpop.f32.mrb[11].mxu1 }
 0x104   :  { %v1011_v18 = vpack.c.bf16 %v272_v10, %v270_v6  ;;  %v1035_v19 = vpack.c.bf16 %v312_v11, %v310_v7  ;;  %v276_v20 = vadd.f32 %v275_v16, %v1255_v27  ;;  %v316_v21 = vadd.f32 %v315_v17, %v1255_v27 }
 0x106   :  { %854 = vst [vmem:[#allocation5 + $0x60] sm:$0xff] %v1011_v18  ;;  %878 = vst [vmem:[#allocation5 + $0x120] sm:$0xff] %v1035_v19  ;;  %v1014_v23 = vpack.c.bf16 %v276_v20, %v274_v14  ;;  %v1038_v25 = vpack.c.bf16 %v316_v21, %v314_v15 }
 0x108   :  { %857 = vst [vmem:[#allocation5 + $0x78] sm:$0xff] %v1014_v23  ;;  %881 = vst [vmem:[#allocation5 + $0x138] sm:$0xff] %v1038_v25  ;;  %v279_v28 = vpop.f32.mrb[12].mxu0  ;;  %v319_v29 = vpop.f32.mrb[12].mxu1 }
 0x109   :  { %v280_v30 = vadd.f32 %v279_v28, %v1252_v26  ;;  %v320_v31 = vadd.f32 %v319_v29, %v1252_v26  ;;  %v281_v32 = vpop.f32.mrb[13].mxu0  ;;  %v321_v33 = vpop.f32.mrb[13].mxu1 }
 0x10a   :  { %v282_v36 = vadd.f32 %v281_v32, %v1255_v27  ;;  %v322_v37 = vadd.f32 %v321_v33, %v1255_v27  ;;  %v283_v38 = vpop.f32.mrb[14].mxu0  ;;  %v323_v39 = vpop.f32.mrb[14].mxu1 }
 0x10b   :  { %v284_v42 = vadd.f32 %v283_v38, %v1252_v26  ;;  %v324_v43 = vadd.f32 %v323_v39, %v1252_v26  ;;  %v285_v44 = vpop.f32.mrb[15].mxu0  ;;  %v325_v45 = vpop.f32.mrb[15].mxu1  ;;  %v1300_v26 = vrot.slane %v1248_v24, %v74_v40 }
 0x10c   :  { %v1017_v46 = vpack.c.bf16 %v282_v36, %v280_v30  ;;  %v1041_v47 = vpack.c.bf16 %v322_v37, %v320_v31  ;;  %v286_v48 = vadd.f32 %v285_v44, %v1255_v27  ;;  %v326_v49 = vadd.f32 %v325_v45, %v1255_v27 }
 0x10e   :  { %860 = vst [vmem:[#allocation5 + $0x90] sm:$0xff] %v1017_v46  ;;  %884 = vst [vmem:[#allocation5 + $0x150] sm:$0xff] %v1041_v47  ;;  %v1020_v22 = vpack.c.bf16 %v286_v48, %v284_v42  ;;  %v1044_v52 = vpack.c.bf16 %v326_v49, %v324_v43 }
 0x110   :  { %863 = vst [vmem:[#allocation5 + $0xa8] sm:$0xff] %v1020_v22  ;;  %887 = vst [vmem:[#allocation5 + $0x168] sm:$0xff] %v1044_v52  ;;  %v362_v54 = vpop.f32.mrb[16].mxu1  ;;  %v475_v27 = vpop.f32.mrb[16].mxu0 }
 0x111   :  { %v363_v55 = vadd.f32 %v362_v54, %v1294_v50  ;;  %v476_v56 = vadd.f32 %v475_v27, %v1297_v51  ;;  %v364_v57 = vpop.f32.mrb[17].mxu1  ;;  %v477_v58 = vpop.f32.mrb[17].mxu0 }
 0x112   :  { %v365_v59 = vadd.f32 %v364_v57, %v1300_v26  ;;  %v478_v60 = vadd.f32 %v477_v58, %v1303_v53  ;;  %v366_v61 = vpop.f32.mrb[18].mxu1  ;;  %v479_v62 = vpop.f32.mrb[18].mxu0 }
 0x113   :  { %v367_v63 = vadd.f32 %v366_v61, %v1294_v50  ;;  %v480_v24 = vadd.f32 %v479_v62, %v1297_v51  ;;  %v368_v0 = vpop.f32.mrb[19].mxu1  ;;  %v481_v1 = vpop.f32.mrb[19].mxu0 }
 0x114   :  { %v1000_v2 = vpack.c.bf16 %v365_v59, %v363_v55  ;;  %v1001_v3 = vpack.c.bf16 %v478_v60, %v476_v56  ;;  %v369_v4 = vadd.f32 %v368_v0, %v1300_v26  ;;  %v482_v5 = vadd.f32 %v481_v1, %v1303_v53 }
 0x116   :  { %843 = vst [vmem:[#allocation5 + $0x8] sm:$0xff] %v1000_v2  ;;  %844 = vst [vmem:[#allocation5 + $0x10] sm:$0xff] %v1001_v3  ;;  %v1003_v6 = vpack.c.bf16 %v369_v4, %v367_v63  ;;  %v1004_v7 = vpack.c.bf16 %v482_v5, %v480_v24 }
 0x118   :  { %846 = vst [vmem:[#allocation5 + $0x20] sm:$0xff] %v1003_v6  ;;  %847 = vst [vmem:[#allocation5 + $0x28] sm:$0xff] %v1004_v7  ;;  %v372_v8 = vpop.f32.mrb[20].mxu1  ;;  %v485_v9 = vpop.f32.mrb[20].mxu0 }
 0x119   :  { %v373_v10 = vadd.f32 %v372_v8, %v1294_v50  ;;  %v486_v11 = vadd.f32 %v485_v9, %v1297_v51  ;;  %v374_v12 = vpop.f32.mrb[21].mxu1  ;;  %v487_v13 = vpop.f32.mrb[21].mxu0 }
 0x11a   :  { %v375_v14 = vadd.f32 %v374_v12, %v1300_v26  ;;  %v488_v15 = vadd.f32 %v487_v13, %v1303_v53  ;;  %v376_v16 = vpop.f32.mrb[22].mxu1  ;;  %v489_v17 = vpop.f32.mrb[22].mxu0 }
 0x11b   :  { %v377_v18 = vadd.f32 %v376_v16, %v1294_v50  ;;  %v490_v19 = vadd.f32 %v489_v17, %v1297_v51  ;;  %v378_v20 = vpop.f32.mrb[23].mxu1  ;;  %v491_v21 = vpop.f32.mrb[23].mxu0 }
 0x11c   :  { %v1006_v23 = vpack.c.bf16 %v375_v14, %v373_v10  ;;  %v1007_v25 = vpack.c.bf16 %v488_v15, %v486_v11  ;;  %v379_v28 = vadd.f32 %v378_v20, %v1300_v26  ;;  %v492_v29 = vadd.f32 %v491_v21, %v1303_v53 }
 0x11e   :  { %849 = vst [vmem:[#allocation5 + $0x38] sm:$0xff] %v1006_v23  ;;  %850 = vst [vmem:[#allocation5 + $0x40] sm:$0xff] %v1007_v25  ;;  %v1009_v30 = vpack.c.bf16 %v379_v28, %v377_v18  ;;  %v1010_v31 = vpack.c.bf16 %v492_v29, %v490_v19 }
 0x120   :  { %852 = vst [vmem:[#allocation5 + $0x50] sm:$0xff] %v1009_v30  ;;  %853 = vst [vmem:[#allocation5 + $0x58] sm:$0xff] %v1010_v31  ;;  %v382_v32 = vpop.f32.mrb[24].mxu1  ;;  %v495_v33 = vpop.f32.mrb[24].mxu0 }
 0x121   :  { %v383_v34 = vadd.f32 %v382_v32, %v1294_v50  ;;  %v496_v35 = vadd.f32 %v495_v33, %v1297_v51  ;;  %v384_v36 = vpop.f32.mrb[25].mxu1  ;;  %v497_v37 = vpop.f32.mrb[25].mxu0 }
 0x122   :  { %v385_v38 = vadd.f32 %v384_v36, %v1300_v26  ;;  %v498_v39 = vadd.f32 %v497_v37, %v1303_v53  ;;  %v386_v40 = vpop.f32.mrb[26].mxu1  ;;  %v499_v41 = vpop.f32.mrb[26].mxu0 }
 0x123   :  { %v387_v42 = vadd.f32 %v386_v40, %v1294_v50  ;;  %v500_v43 = vadd.f32 %v499_v41, %v1297_v51  ;;  %v388_v44 = vpop.f32.mrb[27].mxu1  ;;  %v501_v45 = vpop.f32.mrb[27].mxu0 }
 0x124   :  { %v1012_v46 = vpack.c.bf16 %v385_v38, %v383_v34  ;;  %v1013_v47 = vpack.c.bf16 %v498_v39, %v496_v35  ;;  %v389_v48 = vadd.f32 %v388_v44, %v1300_v26  ;;  %v502_v49 = vadd.f32 %v501_v45, %v1303_v53 }
 0x126   :  { %855 = vst [vmem:[#allocation5 + $0x68] sm:$0xff] %v1012_v46  ;;  %856 = vst [vmem:[#allocation5 + $0x70] sm:$0xff] %v1013_v47  ;;  %v1015_v22 = vpack.c.bf16 %v389_v48, %v387_v42  ;;  %v1016_v52 = vpack.c.bf16 %v502_v49, %v500_v43 }
 0x128   :  { %858 = vst [vmem:[#allocation5 + $0x80] sm:$0xff] %v1015_v22  ;;  %859 = vst [vmem:[#allocation5 + $0x88] sm:$0xff] %v1016_v52  ;;  %v392_v54 = vpop.f32.mrb[28].mxu1  ;;  %v505_v27 = vpop.f32.mrb[28].mxu0 }
 0x129   :  { %v393_v55 = vadd.f32 %v392_v54, %v1294_v50  ;;  %v506_v56 = vadd.f32 %v505_v27, %v1297_v51  ;;  %v394_v57 = vpop.f32.mrb[29].mxu1  ;;  %v507_v58 = vpop.f32.mrb[29].mxu0 }
 0x12a   :  { %v395_v59 = vadd.f32 %v394_v57, %v1300_v26  ;;  %v508_v60 = vadd.f32 %v507_v58, %v1303_v53  ;;  %v396_v61 = vpop.f32.mrb[30].mxu1  ;;  %v509_v62 = vpop.f32.mrb[30].mxu0 }
 0x12b   :  { %v397_v63 = vadd.f32 %v396_v61, %v1294_v50  ;;  %v510_v24 = vadd.f32 %v509_v62, %v1297_v51  ;;  %v398_v0 = vpop.f32.mrb[31].mxu1  ;;  %v511_v1 = vpop.f32.mrb[31].mxu0 }
 0x12c   :  { %v1018_v2 = vpack.c.bf16 %v395_v59, %v393_v55  ;;  %v1019_v3 = vpack.c.bf16 %v508_v60, %v506_v56  ;;  %v399_v4 = vadd.f32 %v398_v0, %v1300_v26  ;;  %v512_v5 = vadd.f32 %v511_v1, %v1303_v53 }
 0x12e   :  { %861 = vst [vmem:[#allocation5 + $0x98] sm:$0xff] %v1018_v2  ;;  %862 = vst [vmem:[#allocation5 + $0xa0] sm:$0xff] %v1019_v3  ;;  %v1021_v6 = vpack.c.bf16 %v399_v4, %v397_v63  ;;  %v1022_v7 = vpack.c.bf16 %v512_v5, %v510_v24 }
 0x130   :  { %864 = vst [vmem:[#allocation5 + $0xb0] sm:$0xff] %v1021_v6  ;;  %865 = vst [vmem:[#allocation5 + $0xb8] sm:$0xff] %v1022_v7  ;;  %v402_v8 = vpop.f32.mrb[32].mxu1  ;;  %v515_v9 = vpop.f32.mrb[32].mxu0 }
 0x131   :  { %v403_v10 = vadd.f32 %v402_v8, %v1294_v50  ;;  %v516_v11 = vadd.f32 %v515_v9, %v1297_v51  ;;  %v404_v12 = vpop.f32.mrb[33].mxu1  ;;  %v517_v13 = vpop.f32.mrb[33].mxu0 }
 0x132   :  { %v405_v14 = vadd.f32 %v404_v12, %v1300_v26  ;;  %v518_v15 = vadd.f32 %v517_v13, %v1303_v53  ;;  %v406_v16 = vpop.f32.mrb[34].mxu1  ;;  %v519_v17 = vpop.f32.mrb[34].mxu0 }
 0x133   :  { %v407_v18 = vadd.f32 %v406_v16, %v1294_v50  ;;  %v520_v19 = vadd.f32 %v519_v17, %v1297_v51  ;;  %v408_v20 = vpop.f32.mrb[35].mxu1  ;;  %v521_v21 = vpop.f32.mrb[35].mxu0 }
 0x134   :  { %v1024_v23 = vpack.c.bf16 %v405_v14, %v403_v10  ;;  %v1025_v25 = vpack.c.bf16 %v518_v15, %v516_v11  ;;  %v409_v28 = vadd.f32 %v408_v20, %v1300_v26  ;;  %v522_v29 = vadd.f32 %v521_v21, %v1303_v53 }
 0x136   :  { %867 = vst [vmem:[#allocation5 + $0xc8] sm:$0xff] %v1024_v23  ;;  %868 = vst [vmem:[#allocation5 + $0xd0] sm:$0xff] %v1025_v25  ;;  %v1027_v30 = vpack.c.bf16 %v409_v28, %v407_v18  ;;  %v1028_v31 = vpack.c.bf16 %v522_v29, %v520_v19 }
 0x138   :  { %870 = vst [vmem:[#allocation5 + $0xe0] sm:$0xff] %v1027_v30  ;;  %871 = vst [vmem:[#allocation5 + $0xe8] sm:$0xff] %v1028_v31  ;;  %v412_v32 = vpop.f32.mrb[36].mxu1  ;;  %v525_v33 = vpop.f32.mrb[36].mxu0 }
 0x139   :  { %v413_v34 = vadd.f32 %v412_v32, %v1294_v50  ;;  %v526_v35 = vadd.f32 %v525_v33, %v1297_v51  ;;  %v414_v36 = vpop.f32.mrb[37].mxu1  ;;  %v527_v37 = vpop.f32.mrb[37].mxu0 }
 0x13a   :  { %v415_v38 = vadd.f32 %v414_v36, %v1300_v26  ;;  %v528_v39 = vadd.f32 %v527_v37, %v1303_v53  ;;  %v416_v40 = vpop.f32.mrb[38].mxu1  ;;  %v529_v41 = vpop.f32.mrb[38].mxu0 }
 0x13b   :  { %v417_v42 = vadd.f32 %v416_v40, %v1294_v50  ;;  %v530_v43 = vadd.f32 %v529_v41, %v1297_v51  ;;  %v418_v44 = vpop.f32.mrb[39].mxu1  ;;  %v531_v45 = vpop.f32.mrb[39].mxu0 }
 0x13c   :  { %v1030_v46 = vpack.c.bf16 %v415_v38, %v413_v34  ;;  %v1031_v47 = vpack.c.bf16 %v528_v39, %v526_v35  ;;  %v419_v48 = vadd.f32 %v418_v44, %v1300_v26  ;;  %v532_v49 = vadd.f32 %v531_v45, %v1303_v53 }
 0x13e   :  { %873 = vst [vmem:[#allocation5 + $0xf8] sm:$0xff] %v1030_v46  ;;  %874 = vst [vmem:[#allocation5 + $0x100] sm:$0xff] %v1031_v47  ;;  %v1033_v22 = vpack.c.bf16 %v419_v48, %v417_v42  ;;  %v1034_v52 = vpack.c.bf16 %v532_v49, %v530_v43 }
 0x140   :  { %876 = vst [vmem:[#allocation5 + $0x110] sm:$0xff] %v1033_v22  ;;  %877 = vst [vmem:[#allocation5 + $0x118] sm:$0xff] %v1034_v52  ;;  %v422_v54 = vpop.f32.mrb[40].mxu1  ;;  %v535_v27 = vpop.f32.mrb[40].mxu0 }
 0x141   :  { %v423_v55 = vadd.f32 %v422_v54, %v1294_v50  ;;  %v536_v56 = vadd.f32 %v535_v27, %v1297_v51  ;;  %v424_v57 = vpop.f32.mrb[41].mxu1  ;;  %v537_v58 = vpop.f32.mrb[41].mxu0 }
 0x142   :  { %v425_v59 = vadd.f32 %v424_v57, %v1300_v26  ;;  %v538_v60 = vadd.f32 %v537_v58, %v1303_v53  ;;  %v426_v61 = vpop.f32.mrb[42].mxu1  ;;  %v539_v62 = vpop.f32.mrb[42].mxu0 }
 0x143   :  { %v427_v63 = vadd.f32 %v426_v61, %v1294_v50  ;;  %v540_v24 = vadd.f32 %v539_v62, %v1297_v51  ;;  %v428_v0 = vpop.f32.mrb[43].mxu1  ;;  %v541_v1 = vpop.f32.mrb[43].mxu0 }
 0x144   :  { %v1036_v2 = vpack.c.bf16 %v425_v59, %v423_v55  ;;  %v1037_v3 = vpack.c.bf16 %v538_v60, %v536_v56  ;;  %v429_v4 = vadd.f32 %v428_v0, %v1300_v26  ;;  %v542_v5 = vadd.f32 %v541_v1, %v1303_v53 }
 0x146   :  { %879 = vst [vmem:[#allocation5 + $0x128] sm:$0xff] %v1036_v2  ;;  %880 = vst [vmem:[#allocation5 + $0x130] sm:$0xff] %v1037_v3  ;;  %v1039_v6 = vpack.c.bf16 %v429_v4, %v427_v63  ;;  %v1040_v7 = vpack.c.bf16 %v542_v5, %v540_v24 }
 0x148   :  { %882 = vst [vmem:[#allocation5 + $0x140] sm:$0xff] %v1039_v6  ;;  %883 = vst [vmem:[#allocation5 + $0x148] sm:$0xff] %v1040_v7  ;;  %v432_v8 = vpop.f32.mrb[44].mxu1  ;;  %v545_v9 = vpop.f32.mrb[44].mxu0 }
 0x149   :  { %v433_v10 = vadd.f32 %v432_v8, %v1294_v50  ;;  %v546_v11 = vadd.f32 %v545_v9, %v1297_v51  ;;  %v434_v12 = vpop.f32.mrb[45].mxu1  ;;  %v547_v13 = vpop.f32.mrb[45].mxu0 }
 0x14a   :  { %v435_v14 = vadd.f32 %v434_v12, %v1300_v26  ;;  %v548_v15 = vadd.f32 %v547_v13, %v1303_v53  ;;  %v436_v16 = vpop.f32.mrb[46].mxu1  ;;  %v549_v17 = vpop.f32.mrb[46].mxu0 }
 0x14b   :  { %v437_v18 = vadd.f32 %v436_v16, %v1294_v50  ;;  %v550_v19 = vadd.f32 %v549_v17, %v1297_v51  ;;  %v438_v20 = vpop.f32.mrb[47].mxu1  ;;  %v551_v21 = vpop.f32.mrb[47].mxu0 }
 0x14c   :  { %v1042_v23 = vpack.c.bf16 %v435_v14, %v433_v10  ;;  %v1043_v25 = vpack.c.bf16 %v548_v15, %v546_v11  ;;  %v439_v28 = vadd.f32 %v438_v20, %v1300_v26  ;;  %v552_v29 = vadd.f32 %v551_v21, %v1303_v53 }
 0x14e   :  { %885 = vst [vmem:[#allocation5 + $0x158] sm:$0xff] %v1042_v23  ;;  %886 = vst [vmem:[#allocation5 + $0x160] sm:$0xff] %v1043_v25  ;;  %v1045_v30 = vpack.c.bf16 %v439_v28, %v437_v18  ;;  %v1046_v31 = vpack.c.bf16 %v552_v29, %v550_v19 }
 0x150   :  { %888 = vst [vmem:[#allocation5 + $0x170] sm:$0xff] %v1045_v30  ;;  %889 = vst [vmem:[#allocation5 + $0x178] sm:$0xff] %v1046_v31 }
 0x151   :  { %1115 = shalt.err (!%p1112_p12)
}
 0x152   :  { %s1116_s19 = scalar_lea.hbm %s1387_s3, 6144 }
 0x153   :  { %p1117_p13 = scmp.ne.s32.totalorder %s1387_s3, %s1116_s19  ;;  %p1120_p0 = scmp.lt.u32.totalorder %s1116_s19, %s1387_s3 }
 0x155   :  { %p1122_p1 = pnand %p1120_p0, %p1117_p13 }
 0x157   :  { %1125 = shalt.err (!%p1122_p1)
}
 0x158   :  { %901 = dma.vmem_to_hbm [thread:$0]  %s896_s15, 6144, %s1387_s3, [#allocation4], %s1131_s22, %s1131_s22, %s1132_s23  }
 0x159   :  { %1128 = dma.done.wait [#allocation4], 6144  }
 0x15a   :  { %1129 = vsyncadd [#allocation4], 4294961152 }
 0x15b   :  { %905 = vsyncpa [#allocation3], 1 }
 0x15c   :  { %906 = vsyncpa [#allocation4], 1 }

</bundles_post_ra>
